<compile_context>
chip_gen: v6e
topology: v6e:2x2x1
jax: 0.10.0
libtpu: 0.0.40
codegen_flags: <defaults>
</compile_context>

<pallas_src>
import jax
import jax.numpy as jnp
from jax.experimental import pallas as pl
from jax.experimental.pallas import tpu as pltpu

LANES = 128


def _enhance_sat_kernel(factor_ref, x_ref, o_ref):
    # block: (1, 3, tile_rows, lane); each channel slab is (tile_rows, lane).
    r = jnp.clip(x_ref[0, 0, :, :], 0.0, 1.0)
    g = jnp.clip(x_ref[0, 1, :, :], 0.0, 1.0)
    b = jnp.clip(x_ref[0, 2, :, :], 0.0, 1.0)
    f = factor_ref[0].astype(r.dtype)                 # runtime scalar, no promote

    v = jnp.maximum(jnp.maximum(r, g), b)             # value  (HSV V)
    mn = jnp.minimum(jnp.minimum(r, g), b)
    c = v - mn                                        # chroma (= S * V)
    c_new = jnp.minimum(c * f, v)                     # factor >= 0 (host-clamped)
    ratio = c_new / jnp.maximum(c, 1e-30)             # gray pixels -> ratio ~0 -> out = v

    # out <= v <= 1 exactly (ratio >= 0, v - x_i >= 0); only guard tiny negative
    # rounding below 0.  Upper clamp is algebraically redundant -> dropped.
    o_ref[0, 0, :, :] = jnp.maximum(v - ratio * (v - r), 0.0)
    o_ref[0, 1, :, :] = jnp.maximum(v - ratio * (v - g), 0.0)
    o_ref[0, 2, :, :] = jnp.maximum(v - ratio * (v - b), 0.0)


def _sublane_quantum(dtype):
    itemsize = jnp.dtype(dtype).itemsize
    return max(8, 32 // itemsize)        # 8 for 4B, 16 for 2B, 32 for 1B dtypes


def enhance_saturation_forward(x, saturation_factor=1.0, *, tile_bytes=3 << 20):
    """Pallas TPU implementation of EnhanceSaturation.forward. x is NCHW, C==3."""
    N, C, H, W = x.shape
    assert C == 3, "EnhanceSaturation expects RGB input (C == 3)"
    dtype = x.dtype
    itemsize = jnp.dtype(dtype).itemsize
    q = _sublane_quantum(dtype)

    # factor < 0 in the torch module clamps S to 0 (gray output), identical to
    # factor == 0 here -> clamp on host (trace-safe, no recompile per value).
    factor = jnp.maximum(jnp.asarray(saturation_factor, jnp.float32), 0.0).reshape(1)

    P = H * W
    if P % LANES == 0:
        # lane-dense layout: pure contiguous split of the trailing H*W axis
        rows, lane = P // LANES, LANES
        x_k = x.reshape(N, 3, rows, LANES)
    else:
        # ragged tail: tile the natural (H, W) layout (full-extent last dim) —
        # no pad/slice, no extra HBM passes.
        rows, lane = H, W
        x_k = x

    # row tile: ~tile_bytes per block (3 channels), multiple of the sublane quantum
    tr = tile_bytes // (3 * lane * itemsize)
    tr = max(q, (tr // q) * q)
    if tr >= rows:
        tr = rows                                      # full extent is always legal
    # keep >= 2 grid steps so both v7x TensorCores get work when N == 1
    if N * pl.cdiv(rows, tr) < 2 and rows >= 2 * q:
        half = -(-rows // 2)
        tr = max(q, (-(-half // q)) * q)

    grid = (N, pl.cdiv(rows, tr))
    block_bytes = 3 * tr * lane * itemsize
    vmem_limit = int(min(48 << 20, max(32 << 20, 4 * block_bytes + (4 << 20))))

    out = pl.pallas_call(
        _enhance_sat_kernel,
        out_shape=jax.ShapeDtypeStruct(x_k.shape, dtype),
        grid=grid,
        in_specs=[
            pl.BlockSpec(memory_space=pltpu.MemorySpace.SMEM),        # factor scalar
            pl.BlockSpec((1, 3, tr, lane), lambda n, r: (n, 0, r, 0)),
        ],
        out_specs=pl.BlockSpec((1, 3, tr, lane), lambda n, r: (n, 0, r, 0)),
        compiler_params=pltpu.CompilerParams(
            dimension_semantics=("parallel", "parallel"),
            vmem_limit_bytes=vmem_limit),
    )(factor, x_k)

    return out.reshape(N, 3, H, W)


# ----------------------- pure-JAX reference (HSV round trip) -----------------
def _ref_rgb_to_hsv(x):
    r, g, b = x[:, 0], x[:, 1], x[:, 2]
    maxc = jnp.maximum(jnp.maximum(r, g), b)
    minc = jnp.minimum(jnp.minimum(r, g), b)
    delta = maxc - minc
    safe_delta = jnp.where(delta > 0, delta, 1.0)
    s = jnp.where(maxc > 0, delta / jnp.where(maxc > 0, maxc, 1.0), 0.0)
    rc = (maxc - r) / safe_delta
    gc = (maxc - g) / safe_delta
    bc = (maxc - b) / safe_delta
    h = jnp.where(maxc == r, bc - gc,
                  jnp.where(maxc == g, 2.0 + rc - bc, 4.0 + gc - rc))
    h = jnp.where(delta > 0, (h / 6.0) % 1.0, 0.0)
    return jnp.stack([h, s, maxc], axis=1)


def _ref_hsv_to_rgb(hsv):
    h, s, v = hsv[:, 0], hsv[:, 1], hsv[:, 2]
    i = jnp.floor(h * 6.0)
    f = h * 6.0 - i
    p = v * (1.0 - s)
    q = v * (1.0 - s * f)
    t = v * (1.0 - s * (1.0 - f))
    i = i.astype(jnp.int32) % 6
    conds = [i == 0, i == 1, i == 2, i == 3, i == 4, i == 5]
    r = jnp.select(conds, [v, q, p, p, t, v])
    g = jnp.select(conds, [t, v, v, q, p, p])
    b = jnp.select(conds, [p, p, t, v, v, q])
    return jnp.stack([r, g, b], axis=1)


def _ref_enhance_saturation(x, factor):
    x = jnp.clip(x, 0.0, 1.0)
    hsv = _ref_rgb_to_hsv(x)
    s = jnp.clip(hsv[:, 1] * factor, 0.0, 1.0)
    rgb = _ref_hsv_to_rgb(jnp.stack([hsv[:, 0], s, hsv[:, 2]], axis=1))
    return jnp.clip(rgb, 0.0, 1.0)


if __name__ == "__main__":
    key = jax.random.PRNGKey(0)
    k1, k2 = jax.random.split(key)

    # values partly outside [0,1] so the leading clamp matters; C=3 (RGB)
    x = jax.random.normal(k1, (2, 3, 16, 16), dtype=jnp.float32) * 0.8 + 0.5
    factor = 1.5

    y = jax.block_until_ready(enhance_saturation_forward(x, factor))
    y1 = jax.block_until_ready(enhance_saturation_forward(x, 1.0))
    y_ref = _ref_enhance_saturation(x, factor)
    y_ref1 = jnp.clip(x, 0.0, 1.0)

    assert y.shape == x.shape and y.dtype == x.dtype
    assert jnp.allclose(y, y_ref, atol=1e-5), "mismatch vs HSV round-trip reference"
    assert jnp.allclose(y1, y_ref1, atol=1e-6), "factor=1 should reduce to clamp(0,1)"

    # ragged path: H*W not a multiple of 128 -> no pad, tiles the natural layout
    xr = jax.random.normal(k2, (1, 3, 9, 20), dtype=jnp.float32) * 0.8 + 0.5
    yr = jax.block_until_ready(enhance_saturation_forward(xr, 0.5))
    yr_ref = _ref_enhance_saturation(xr, 0.5)
    assert jnp.allclose(yr, yr_ref, atol=1e-5), "ragged-shape path mismatch"

    print("KERNEL_OK")
</pallas_src>

<mosaic_0001>
module attributes {stable_mosaic.version = 11 : i64} {
  func.func @_enhance_sat_kernel(%arg0: i32, %arg1: i32, %arg2: memref<1xf32, #tpu.memory_space<smem>>, %arg3: memref<1x3x2x128xf32, #tpu.memory_space<vmem>>, %arg4: memref<1x3x2x128xf32, #tpu.memory_space<vmem>>) attributes {dimension_semantics = [#tpu.dimension_semantics<parallel>, #tpu.dimension_semantics<parallel>], iteration_bounds = array<i64: 2, 1>, scalar_prefetch = 0 : i64, scratch_operands = 0 : i64, tpu.core_type = #tpu.core_type<tc>, window_params = [{transform_indices = @transform_0, window_bounds = array<i64: 1>}, {transform_indices = @transform_1, window_bounds = array<i64: 1, 3, 2, 128>}, {transform_indices = @transform_2, window_bounds = array<i64: 1, 3, 2, 128>}]} {
    %c0 = arith.constant 0 : index
    %c0_0 = arith.constant 0 : index
    %c0_1 = arith.constant 0 : index
    %c0_2 = arith.constant 0 : index
    %0 = vector.load %arg3[%c0, %c0_0, %c0_1, %c0_2] : memref<1x3x2x128xf32, #tpu.memory_space<vmem>>, vector<1x1x2x128xf32>
    %1 = vector.shape_cast %0 : vector<1x1x2x128xf32> to vector<2x128xf32>
    %cst = arith.constant 0.000000e+00 : f32
    %cst_3 = arith.constant 1.000000e+00 : f32
    %2 = vector.broadcast %cst : f32 to vector<2x128xf32>
    %3 = arith.maximumf %2, %1 : vector<2x128xf32>
    %4 = vector.broadcast %cst_3 : f32 to vector<2x128xf32>
    %5 = arith.minimumf %4, %3 : vector<2x128xf32>
    %c0_4 = arith.constant 0 : index
    %c1 = arith.constant 1 : index
    %c0_5 = arith.constant 0 : index
    %c0_6 = arith.constant 0 : index
    %6 = vector.load %arg3[%c0_4, %c1, %c0_5, %c0_6] : memref<1x3x2x128xf32, #tpu.memory_space<vmem>>, vector<1x1x2x128xf32>
    %7 = vector.shape_cast %6 : vector<1x1x2x128xf32> to vector<2x128xf32>
    %cst_7 = arith.constant 0.000000e+00 : f32
    %cst_8 = arith.constant 1.000000e+00 : f32
    %8 = vector.broadcast %cst_7 : f32 to vector<2x128xf32>
    %9 = arith.maximumf %8, %7 : vector<2x128xf32>
    %10 = vector.broadcast %cst_8 : f32 to vector<2x128xf32>
    %11 = arith.minimumf %10, %9 : vector<2x128xf32>
    %c0_9 = arith.constant 0 : index
    %c2 = arith.constant 2 : index
    %c0_10 = arith.constant 0 : index
    %c0_11 = arith.constant 0 : index
    %12 = vector.load %arg3[%c0_9, %c2, %c0_10, %c0_11] : memref<1x3x2x128xf32, #tpu.memory_space<vmem>>, vector<1x1x2x128xf32>
    %13 = vector.shape_cast %12 : vector<1x1x2x128xf32> to vector<2x128xf32>
    %cst_12 = arith.constant 0.000000e+00 : f32
    %cst_13 = arith.constant 1.000000e+00 : f32
    %14 = vector.broadcast %cst_12 : f32 to vector<2x128xf32>
    %15 = arith.maximumf %14, %13 : vector<2x128xf32>
    %16 = vector.broadcast %cst_13 : f32 to vector<2x128xf32>
    %17 = arith.minimumf %16, %15 : vector<2x128xf32>
    %c0_14 = arith.constant 0 : index
    %18 = memref.load %arg2[%c0_14] : memref<1xf32, #tpu.memory_space<smem>>
    %19 = arith.maximumf %5, %11 : vector<2x128xf32>
    %20 = arith.maximumf %19, %17 : vector<2x128xf32>
    %21 = arith.minimumf %5, %11 : vector<2x128xf32>
    %22 = arith.minimumf %21, %17 : vector<2x128xf32>
    %23 = arith.subf %20, %22 : vector<2x128xf32>
    %24 = vector.broadcast %18 : f32 to vector<2x128xf32>
    %25 = arith.mulf %23, %24 : vector<2x128xf32>
    %26 = arith.minimumf %25, %20 : vector<2x128xf32>
    %cst_15 = arith.constant 1.000000e-30 : f32
    %27 = vector.broadcast %cst_15 : f32 to vector<2x128xf32>
    %28 = arith.maximumf %23, %27 : vector<2x128xf32>
    %29 = arith.divf %26, %28 : vector<2x128xf32>
    %30 = arith.subf %20, %5 : vector<2x128xf32>
    %31 = arith.mulf %29, %30 : vector<2x128xf32>
    %32 = arith.subf %20, %31 : vector<2x128xf32>
    %cst_16 = arith.constant 0.000000e+00 : f32
    %33 = vector.broadcast %cst_16 : f32 to vector<2x128xf32>
    %34 = arith.maximumf %32, %33 : vector<2x128xf32>
    %c0_17 = arith.constant 0 : index
    %c0_18 = arith.constant 0 : index
    %c0_19 = arith.constant 0 : index
    %c0_20 = arith.constant 0 : index
    %35 = vector.load %arg4[%c0_17, %c0_18, %c0_19, %c0_20] : memref<1x3x2x128xf32, #tpu.memory_space<vmem>>, vector<1x1x2x128xf32>
    %36 = vector.shape_cast %35 : vector<1x1x2x128xf32> to vector<2x128xf32>
    %37 = vector.shape_cast %34 : vector<2x128xf32> to vector<1x1x2x128xf32>
    tpu.vector_store %arg4[%c0_17, %c0_18, %c0_19, %c0_20], %37 {strides = array<i32>} : memref<1x3x2x128xf32, #tpu.memory_space<vmem>>, vector<1x1x2x128xf32>,
    %38 = arith.subf %20, %11 : vector<2x128xf32>
    %39 = arith.mulf %29, %38 : vector<2x128xf32>
    %40 = arith.subf %20, %39 : vector<2x128xf32>
    %cst_21 = arith.constant 0.000000e+00 : f32
    %41 = vector.broadcast %cst_21 : f32 to vector<2x128xf32>
    %42 = arith.maximumf %40, %41 : vector<2x128xf32>
    %c0_22 = arith.constant 0 : index
    %c1_23 = arith.constant 1 : index
    %c0_24 = arith.constant 0 : index
    %c0_25 = arith.constant 0 : index
    %43 = vector.load %arg4[%c0_22, %c1_23, %c0_24, %c0_25] : memref<1x3x2x128xf32, #tpu.memory_space<vmem>>, vector<1x1x2x128xf32>
    %44 = vector.shape_cast %43 : vector<1x1x2x128xf32> to vector<2x128xf32>
    %45 = vector.shape_cast %42 : vector<2x128xf32> to vector<1x1x2x128xf32>
    tpu.vector_store %arg4[%c0_22, %c1_23, %c0_24, %c0_25], %45 {strides = array<i32>} : memref<1x3x2x128xf32, #tpu.memory_space<vmem>>, vector<1x1x2x128xf32>,
    %46 = arith.subf %20, %17 : vector<2x128xf32>
    %47 = arith.mulf %29, %46 : vector<2x128xf32>
    %48 = arith.subf %20, %47 : vector<2x128xf32>
    %cst_26 = arith.constant 0.000000e+00 : f32
    %49 = vector.broadcast %cst_26 : f32 to vector<2x128xf32>
    %50 = arith.maximumf %48, %49 : vector<2x128xf32>
    %c0_27 = arith.constant 0 : index
    %c2_28 = arith.constant 2 : index
    %c0_29 = arith.constant 0 : index
    %c0_30 = arith.constant 0 : index
    %51 = vector.load %arg4[%c0_27, %c2_28, %c0_29, %c0_30] : memref<1x3x2x128xf32, #tpu.memory_space<vmem>>, vector<1x1x2x128xf32>
    %52 = vector.shape_cast %51 : vector<1x1x2x128xf32> to vector<2x128xf32>
    %53 = vector.shape_cast %50 : vector<2x128xf32> to vector<1x1x2x128xf32>
    tpu.vector_store %arg4[%c0_27, %c2_28, %c0_29, %c0_30], %53 {strides = array<i32>} : memref<1x3x2x128xf32, #tpu.memory_space<vmem>>, vector<1x1x2x128xf32>,
    return
  }
  func.func @transform_0(%arg0: i32, %arg1: i32) -> i32 {
    %c0_i32 = arith.constant 0 : i32
    %c0_i32_0 = arith.constant 0 : i32
    return %c0_i32 : i32
  }
  func.func @transform_1(%arg0: i32, %arg1: i32) -> (i32, i32, i32, i32) {
    %c0_i32 = arith.constant 0 : i32
    %c0_i32_0 = arith.constant 0 : i32
    %c0_i32_1 = arith.constant 0 : i32
    return %arg0, %c0_i32, %arg1, %c0_i32_0 : i32, i32, i32, i32
  }
  func.func @transform_2(%arg0: i32, %arg1: i32) -> (i32, i32, i32, i32) {
    %c0_i32 = arith.constant 0 : i32
    %c0_i32_0 = arith.constant 0 : i32
    %c0_i32_1 = arith.constant 0 : i32
    return %arg0, %c0_i32, %arg1, %c0_i32_0 : i32, i32, i32, i32
  }
}

</mosaic_0001>

<bundles_post_ra>
// kernel: tpu_custom_call.1
= control target key start
LH: loop header
LB: loop body
LE: loop exit
PB: predicated region body
PF: predicated region fallthrough
CT: control target
= control target key end

     0   :  { %s689_s0 = inlined_call_operand.<no memory space> [shape: f32[1], index: 0, kind: input, shape index: {}]   ;;  %s690_s1 = inlined_call_operand.hbm [shape: f32[2,3,2,128], index: 1, kind: input, shape index: {}]   ;;  %s691_s2 = inlined_call_operand.hbm [shape: f32[2,3,2,128], index: 2, kind: output, shape index: {}]  }
   0x1   :  { %7 = sst [smem:[#allocation2]] %s689_s0 }
   0x2   :  { %8 = vsyncpa [#allocation4], 0 }
   0x3   :  { %10 = vsyncpa [#allocation4 + $0x1], 0 }
   0x4   :  { %11 = vsyncpa [#allocation5], 0 }
   0x5   :  { %13 = vsyncpa [#allocation5 + $0x1], 0  ;;  %s539_s11 = smov 0   ;;  %s541_s12 = smov 0  }
   0x6   :  { %s543_s13 = smov 0   ;;  %s545_s14 = smov 0  }
   0x7   :  { %s547_s15 = smov 0   ;;  %s549_s16 = smov 0  }
   0x8 LB: > { %s320_s0 = sadd.s32 4294967295, %s513_s16   ;;  %s321_s17 = sadd.s32 4294967294, %s513_s16   ;;  %s513_s16 = sphi %s549_s16, %s19_s16   ;;  %s509_s15 = sphi %s547_s15, %s702_s15   ;;  %s505_s14 = sphi %s545_s14, %s701_s14   ;;  %s501_s13 = sphi %s543_s13, %s700_s13   ;;  %s497_s12 = sphi %s541_s12, %s699_s12   ;;  %s493_s11 = sphi %s539_s11, %s698_s11  }
   0x9   : > { %s31_s18 = sadd.s32 1, %s509_s15  ;;  %s61_s19 = sadd.s32 1, %s501_s13 }
   0xa   : > { %p33_p0 = scmp.ge.s32.totalorder %s31_s18, 2  ;;  %p68_p1 = scmp.ne.s32.totalorder %s501_s13, %s497_s12 }
   0xb   : > { %p69_p2 = scmp.eq.s32.totalorder %s513_s16, 0  ;;  %p74_p3 = scmp.ne.s32.totalorder %s497_s12, %s493_s11 }
   0xc   : > { %s704_s18 = smov (%p33_p0, %s31_s18), 0  ;;  %p75_p5 = scmp.eq.s32.totalorder %s320_s0, 0 }
   0xd   : > { %p580_p4 = por %p69_p2, %p68_p1  ;;  %s56_s21 = ssub.s32 %s509_s15, %s704_s18 }
   0xe   : > { %p100_p6 = scmp.eq.s32.totalorder %s320_s0, 1  ;;  %p59_p7 = scmp.eq.s32.totalorder %s56_s21, 0 }
   0xf   : > { %p586_p8 = por %p75_p5, %p74_p3  ;;  %p106_p10 = scmp.eq.s32.totalorder %s321_s17, 1 }
  0x10   : > { %p590_p9 = por %p100_p6, %p68_p1  ;;  %p349_p13 = scmp.lt.s32.totalorder %s513_s16, 2 }
  0x11   : > { %s595_s24 = scalar_select %p59_p7, %s501_s13, %s61_s19  }
  0x12   : > { %p597_p11 = por %p106_p10, %p74_p3  ;;  %s129_s26 = sand.u32 1, %s501_s13  }
  0x13   : > { %s333_s27 = smul.u32 6, %s129_s26  ;;  %p607_p0 = pnand %p349_p13, %p580_p4 }
  0x14   : > { %s334_s28 = smul.u32 96, %s509_s15  ;;  %p325_p1 = scmp.ge.s32.totalorder %s513_s16, 1 }
  0x15   : > { %s133_s5 = scalar_lea.vmem [#allocation3], %s333_s27  ;;  %s130_s7 = scalar_lea.sflag [#allocation4], %s129_s26 }
  0x16   : > { %s140_s4 = scalar_lea.hbm %s690_s1, %s334_s28  ;;  %s141_s6 = sshll.u32 %s133_s5, 4  ;;  %s142_s6 = int_to_ptr.vmem [resolvable:$true] %s141_s6 }
  0x17   : > { %p407_p2 = pneg %p607_p0  ;;  %s418_s8 = scalar_lea.vmem %s142_s6, 96 }
  0x18   : > { %p419_p3 = scmp.ne.s32.totalorder %s142_s6, %s418_s8  ;;  %s515_s9 = smov [#allocation3]  }
  0x19   : > { %s423_s10 = sshll.u32 %s515_s9, 4  ;;  %s424_s10 = int_to_ptr.vmem [resolvable:$false] %s423_s10 }
  0x1a   : > { %p421_p5 = pnand %p419_p3, %p407_p2  ;;  %s425_s0 = scalar_lea.vmem %s424_s10, 192 }
  0x1b   : > { %p426_p4 = scmp.lt.s32.totalorder %s142_s6, %s424_s10  ;;  %p427_p7 = scmp.lt.s32.totalorder %s425_s0, %s418_s8 }
  0x1c   : > { %p422_p6 = pneg %p421_p5 }
  0x1d   : > { %p428_p10 = por %p427_p7, %p426_p4 }
  0x1f   : > { %p429_p13 = pnand %p428_p10, %p422_p6 }
  0x21   : > { %432 = shalt.err (!%p429_p13)
}
  0x22   : > { %s516_s17 = smov 32   ;;  %s517_s19 = smov 2  }
  0x23   : > { %344 = dma.hbm_to_vmem [thread:$0]  (!%p607_p0), %s140_s4, 96, %s142_s6, %s130_s7, %s516_s17, %s516_s17, %s517_s19  }
  0x24   : > { %p149_p12 = scmp.lt.s32.totalorder %s513_s16, 3 }
  0x26   : > { %p150_p2 = pnand %p325_p1, %p149_p12 }
  0x27   : > { %s623_s20 = sand.u32 (!%p150_p2), 1, %s497_s12  }
  0x28   : > { %153 = sbr.rel (%p150_p2) target bundleno = 96 (0x60), region = 28  ;;  %s156_s26 = scalar_lea.sflag (!%p150_p2), [#allocation4], %s623_s20 }
  0x29   : > { %s335_s21 = smul.u32 (!%p150_p2), 6, %s623_s20 }
  0x2b   : > { %s159_s27 = scalar_lea.vmem (!%p150_p2), [#allocation3], %s335_s21 }
  0x2d   : > { %484 = dma.done.wait (%p586_p8), %s156_s26, 96  }
  0x2e   : > { %486 = vsyncadd (%p586_p8), %s156_s26, 4294967200  ;;  %v180_v0 = vld [vmem:[%s159_s27] sm:$0x3]  ;;  %v326_v1 = vld [vmem:[%s159_s27 + $0x2] sm:$0x3]  ;;  %s191_s28 = sld [smem:[#allocation2]] }
  0x2f   : > { %v327_v2 = vld [vmem:[%s159_s27 + $0x4] sm:$0x3]  ;;  %v181_v3 = vmax.f32 %v180_v0, 0.0  ;;  %v185_v4 = vmax.f32 %v326_v1, 0.0  ;;  %s179_s22 = scalar_lea.vmem [#allocation6], %s335_s21  ;;  %s336_s30 = smul.u32 96, %s505_s14 }
  0x30   : > { %v189_v5 = vmax.f32 %v327_v2, 0.0  ;;  %s235_s29 = sshll.u32 %s179_s22, 4  ;;  %s221_s14 = scalar_lea.sflag [#allocation5], %s623_s20  ;;  %s636_s29 = int_to_ptr.vmem [resolvable:$true] %s235_s29 }
  0x31   : > { %v182_v6 = vmin.f32 %v181_v3, 1.0  ;;  %v186_v7 = vmin.f32 %v185_v4, 1.0  ;;  %s641_s5 = scalar_lea.hbm %s691_s2, %s336_s30  ;;  %s433_s6 = scalar_lea.vmem %s636_s29, 96 }
  0x32   : > { %v190_v8 = vmin.f32 %v189_v5, 1.0  ;;  %p434_p8 = scmp.ne.s32.totalorder %s636_s29, %s433_s6  ;;  %s518_s7 = smov [#allocation6]  }
  0x33   : > { %v192_v9 = vmax.f32 %v182_v6, %v186_v7  ;;  %v194_v10 = vmin.f32 %v182_v6, %v186_v7  ;;  %s437_s8 = sshll.u32 %s518_s7, 4  ;;  %s438_s8 = int_to_ptr.vmem [resolvable:$false] %s437_s8 }
  0x34   : > { %v197_v15 = vstv %s191_s28  ;;  %p435_p12 = pnand %p434_p8, %p590_p9  ;;  %s439_s9 = scalar_lea.vmem %s438_s8, 192 }
  0x35   : > { %v193_v11 = vmax.f32 %v192_v9, %v190_v8  ;;  %v195_v12 = vmin.f32 %v194_v10, %v190_v8  ;;  %p440_p1 = scmp.lt.s32.totalorder %s636_s29, %s438_s8  ;;  %p441_p3 = scmp.lt.s32.totalorder %s439_s9, %s433_s6 }
  0x36   : > { %p436_p0 = pneg %p435_p12 }
  0x37   : > { %v196_v13 = vsub.f32 %v193_v11, %v195_v12  ;;  %v203_v18 = vsub.f32 %v193_v11, %v182_v6  ;;  %v208_v19 = vsub.f32 %v193_v11, %v186_v7  ;;  %v214_v20 = vsub.f32 %v193_v11, %v190_v8  ;;  %p442_p5 = por %p441_p3, %p440_p1 }
  0x39   : > { %v200_v14 = vmax.f32 %v196_v13, 1e-30  ;;  %v198_v16 = vmul.f32 %v197_v15, %v196_v13  ;;  %p443_p6 = pnand %p442_p5, %p436_p0 }
  0x3b   : > { %403 = vrcp.f32 %v200_v14  ;;  %v199_v17 = vmin.f32 %v198_v16, %v193_v11 }
  0x48   : > { %v404_v21 = vpop.eup %403 }
  0x49   : > { %v202_v22 = vmul.f32 %v404_v21, %v199_v17 }
  0x4b   : > { %v204_v23 = vmul.f32 %v203_v18, %v202_v22  ;;  %v209_v24 = vmul.f32 %v208_v19, %v202_v22  ;;  %v215_v25 = vmul.f32 %v214_v20, %v202_v22 }
  0x4d   : > { %v205_v26 = vsub.f32 %v193_v11, %v204_v23  ;;  %v210_v27 = vsub.f32 %v193_v11, %v209_v24  ;;  %v216_v28 = vsub.f32 %v193_v11, %v215_v25 }
  0x4f   : > { %v206_v29 = vmax.f32 %v205_v26, 0.0  ;;  %v211_v30 = vmax.f32 %v210_v27, 0.0  ;;  %v217_v31 = vmax.f32 %v216_v28, 0.0 }
  0x51   : > { %207 = vst [vmem:[%s179_s22] sm:$0x3] %v206_v29  ;;  %328 = vst [vmem:[%s179_s22 + $0x2] sm:$0x3] %v211_v30 }
  0x52   : > { %329 = vst [vmem:[%s179_s22 + $0x4] sm:$0x3] %v217_v31 }
  0x53   : > { %446 = shalt.err (!%p443_p6)
}
  0x54   : > { %s447_s10 = scalar_lea.hbm %s641_s5, 96  ;;  %s451_s19 = scalar_lea.hbm %s691_s2, 192 }
  0x55   : > { %p448_p4 = scmp.ne.s32.totalorder %s641_s5, %s447_s10  ;;  %p452_p13 = scmp.lt.s32.totalorder %s641_s5, %s691_s2 }
  0x56   : > { %p453_p2 = scmp.lt.s32.totalorder %s451_s19, %s447_s10 }
  0x57   : > { %p449_p7 = pnand %p448_p4, %p590_p9 }
  0x58   : > { %p454_p8 = por %p453_p2, %p452_p13 }
  0x59   : > { %p450_p10 = pneg %p449_p7 }
  0x5b   : > { %p455_p12 = pnand %p454_p8, %p450_p10 }
  0x5d   : > { %458 = shalt.err (!%p455_p12)
}
  0x5e   : > { %s519_s27 = smov 32   ;;  %s520_s28 = smov 2  }
  0x5f   : > { %339 = dma.vmem_to_hbm [thread:$0]  (%p590_p9), %s636_s29, 96, %s641_s5, %s221_s14, %s519_s27, %s519_s27, %s520_s28  }
  0x60 PF: > { %s250_s22 = sand.u32 1, %s493_s11   ;;  %p697_p0 = scmp.ge.s32.totalorder %s513_s16, 2 }
  0x61   : > { %s251_s30 = scalar_lea.sflag [#allocation5], %s250_s22 }
  0x62   : > { %p346_p1 = pnand %p697_p0, %p597_p11 }
  0x64   : > { %p347_p3 = pneg %p346_p1 }
  0x66   : > { %488 = dma.done.wait (%p347_p3), %s251_s30, 96  }
  0x67   : > { %490 = vsyncadd (%p347_p3), %s251_s30, 4294967200  ;;  %s19_s16 = sadd.s32 1, %s513_s16   ;;  %s698_s11 = smov %s497_s12 }
  0x68   : > { %p16_p5 = scmp.ge.s32.totalorder %s19_s16, 4   ;;  %s699_s12 = smov %s501_s13 }
  0x69   : > { %s700_s13 = smov %s595_s24  ;;  %s701_s14 = smov %s509_s15 }
  0x6a   : > { %s702_s15 = smov %s704_s18  ;;  %18 = sbr.rel (!%p16_p5) target bundleno = 8 (0x8), region = 77 }
  0x6f   :  { %256 = vsyncpa [#allocation4], 1 }
  0x70   :  { %258 = vsyncpa [#allocation4 + $0x1], 1 }
  0x71   :  { %259 = vsyncpa [#allocation5], 1 }
  0x72   :  { %261 = vsyncpa [#allocation5 + $0x1], 1 }

</bundles_post_ra>
